<compile_context>
chip_gen: v7x
topology: tpu7x:2x2x1
jax: 0.10.0
libtpu: 0.0.40
codegen_flags: <defaults>
</compile_context>

<pallas_src>
import functools

import jax
import jax.numpy as jnp
from jax.experimental import pallas as pl
from jax.experimental.pallas import tpu as pltpu


def _phi_kernel(x_ref, w1_ref, w2_ref, b2_ref, m_ref, o_ref, *, feature_dim):
    """Whole problem in one step: x_ref (Cin+1, B*L) -> o_ref (2F, B*L)."""
    F = feature_dim
    x = x_ref[...]          # (Cin+1, B*L); last row is all ones (conv1 bias col)
    w1 = w1_ref[...]        # (2F, Cin+1) = [conv1.weight | conv1.bias]
    w2 = w2_ref[...]        # (Cout, 2F)
    b2 = b2_ref[...]        # (Cout, 1)
    M = m_ref[...]          # (B*L, B*L) block-diagonal user-mix matrix

    # conv1 (1x1) with folded bias + ReLU: one wide lane-dense matmul.
    h = jnp.maximum(jnp.dot(w1, x, preferred_element_type=jnp.float32), 0.0)

    # postprocess 1: keep first F channels, mix the next F over users (MXU).
    c0 = h[:F]                                                      # (F, B*L)
    c1 = jnp.dot(h[F:2 * F], M, preferred_element_type=jnp.float32)  # (F, B*L)

    # conv2 (1x1): one merged matmul over the sublane-stacked channels.
    c = jnp.concatenate([c0, c1], axis=0)                           # (2F, B*L)
    out = jnp.dot(w2, c, preferred_element_type=jnp.float32) + b2   # (Cout, B*L)

    # postprocess 2: two aligned, unmasked stores (no concat before the store).
    o_ref[:F, :] = out[:F]
    o_ref[F:2 * F, :] = jnp.dot(out[F:2 * F], M,
                                preferred_element_type=jnp.float32)


@functools.partial(jax.jit, static_argnums=(5,))
def phi_forward(x_nchw, w1, b1, w2, b2, feature_dim):
    """x_nchw: (B, Cin, U, W) float32 -> (B, 2*feature_dim, U, W) float32."""
    B, Cin, U, W = x_nchw.shape
    F = feature_dim
    Cout = w2.shape[0]
    L = U * W
    BL = B * L
    # NOTE: U == 1 divides by zero here, same as the PyTorch reference.
    inv_ncat1 = 1.0 / float(U - 1)

    # Batch-in-lanes relayout (few-KB arrays, negligible wrapper cost) plus a
    # ones row so conv1's bias folds into its weight matrix.
    x2d = x_nchw.transpose(1, 0, 2, 3).reshape(Cin, BL)
    x_aug = jnp.concatenate([x2d, jnp.ones((1, BL), jnp.float32)], axis=0)
    w1a = jnp.concatenate([w1, b1[:, None]], axis=1)            # (2F, Cin+1)
    b2c = b2.reshape(-1, 1)                                     # (Cout, 1)

    # Block-diagonal lane-mix matrix:
    #   (h @ M)[f, b*L + u*W + w] = sum_v ex[u, v] * h[f, b*L + v*W + w] / (U-1)
    ex = (jnp.ones((U, U), jnp.float32)
          - jnp.eye(U, dtype=jnp.float32)) * inv_ncat1          # (U, U)
    mix = jnp.kron(ex, jnp.eye(W, dtype=jnp.float32))           # (L, L)
    mix_big = jnp.kron(jnp.eye(B, dtype=jnp.float32), mix)      # (BL, BL)

    kernel = functools.partial(_phi_kernel, feature_dim=F)

    out = pl.pallas_call(
        kernel,
        out_shape=jax.ShapeDtypeStruct((2 * F, BL), jnp.float32),
        grid_spec=pltpu.PrefetchScalarGridSpec(
            num_scalar_prefetch=0,
            grid=(1,),
            in_specs=[
                pl.BlockSpec((Cin + 1, BL), lambda i: (0, 0)),
                pl.BlockSpec((2 * F, Cin + 1), lambda i: (0, 0)),
                pl.BlockSpec((Cout, 2 * F), lambda i: (0, 0)),
                pl.BlockSpec((Cout, 1), lambda i: (0, 0)),
                pl.BlockSpec((BL, BL), lambda i: (0, 0)),
            ],
            out_specs=pl.BlockSpec((2 * F, BL), lambda i: (0, 0)),
        ),
    )(x_aug, w1a, w2, b2c, mix_big)

    # Undo the batch-in-lanes layout (tiny copy outside the kernel).
    return out.reshape(2 * F, B, U, W).transpose(1, 0, 2, 3)


def phi_reference(x_nchw, w1, b1, w2, b2, feature_dim):
    """Pure-JAX reference mirroring the PyTorch forward (NCHW)."""
    F = feature_dim
    U = x_nchw.shape[2]
    n_cat1 = float(U - 1)
    ex = jnp.ones((U, U), jnp.float32) - jnp.eye(U, dtype=jnp.float32)

    def post(h):
        c0 = h[:, :F]
        c1 = jnp.einsum('uv,bfvw->bfuw', ex, h[:, F:2 * F]) / n_cat1
        return jnp.concatenate([c0, c1], axis=1)

    h = jnp.einsum('bchw,oc->bohw', x_nchw, w1) + b1[None, :, None, None]
    h = jnp.maximum(h, 0.0)
    h = post(h)
    h = jnp.einsum('bchw,oc->bohw', h, w2) + b2[None, :, None, None]
    return post(h)


if __name__ == "__main__":
    # params: num_users=8 (the H axis), phi_feature_dim=8,
    #         input_dim=4, output_dim=16 (= 2 * phi_feature_dim)
    B, Cin, U, W = 2, 4, 8, 16
    F = 8
    Cout = 2 * F

    key = jax.random.PRNGKey(0)
    k1, k2, k3, k4, k5 = jax.random.split(key, 5)
    x = jax.random.normal(k1, (B, Cin, U, W), dtype=jnp.float32)
    # deterministic synthetic weights (Conv2d 1x1 -> dense matrices + bias)
    w1 = jax.random.normal(k2, (2 * F, Cin), dtype=jnp.float32) * 0.1
    b1 = jax.random.normal(k3, (2 * F,), dtype=jnp.float32) * 0.1
    w2 = jax.random.normal(k4, (Cout, 2 * F), dtype=jnp.float32) * 0.1
    b2 = jax.random.normal(k5, (Cout,), dtype=jnp.float32) * 0.1

    out = phi_forward(x, w1, b1, w2, b2, F)
    out = jax.block_until_ready(out)

    ref = phi_reference(x, w1, b1, w2, b2, F)
    assert out.shape == (B, 2 * F, U, W), out.shape
    assert jnp.allclose(out, ref, rtol=1e-3, atol=1e-3), \
        float(jnp.max(jnp.abs(out - ref)))

    print("KERNEL_OK")
</pallas_src>

<mosaic_0001>
module attributes {stable_mosaic.version = 11 : i64} {
  func.func @_phi_kernel(%arg0: i32, %arg1: memref<5x256xf32, #tpu.memory_space<vmem>>, %arg2: memref<16x5xf32, #tpu.memory_space<vmem>>, %arg3: memref<16x16xf32, #tpu.memory_space<vmem>>, %arg4: memref<16x1xf32, #tpu.memory_space<vmem>>, %arg5: memref<256x256xf32, #tpu.memory_space<vmem>>, %arg6: memref<16x256xf32, #tpu.memory_space<vmem>>) attributes {dimension_semantics = [#tpu.dimension_semantics<arbitrary>], iteration_bounds = array<i64: 1>, scalar_prefetch = 0 : i64, scratch_operands = 0 : i64, tpu.core_type = #tpu.core_type<tc>, window_params = [{pipeline_mode = #tpu.pipeline_mode<synchronous>, transform_indices = @transform_0, window_bounds = array<i64: 5, 256>}, {pipeline_mode = #tpu.pipeline_mode<synchronous>, transform_indices = @transform_1, window_bounds = array<i64: 16, 5>}, {pipeline_mode = #tpu.pipeline_mode<synchronous>, transform_indices = @transform_2, window_bounds = array<i64: 16, 16>}, {pipeline_mode = #tpu.pipeline_mode<synchronous>, transform_indices = @transform_3, window_bounds = array<i64: 16, 1>}, {pipeline_mode = #tpu.pipeline_mode<synchronous>, transform_indices = @transform_4, window_bounds = array<i64: 256, 256>}, {pipeline_mode = #tpu.pipeline_mode<synchronous>, transform_indices = @transform_5, window_bounds = array<i64: 16, 256>}]} {
    %c0 = arith.constant 0 : index
    %c0_0 = arith.constant 0 : index
    %0 = vector.load %arg1[%c0, %c0_0] : memref<5x256xf32, #tpu.memory_space<vmem>>, vector<5x256xf32>
    %c0_1 = arith.constant 0 : index
    %c0_2 = arith.constant 0 : index
    %1 = vector.load %arg2[%c0_1, %c0_2] : memref<16x5xf32, #tpu.memory_space<vmem>>, vector<16x5xf32>
    %c0_3 = arith.constant 0 : index
    %c0_4 = arith.constant 0 : index
    %2 = vector.load %arg3[%c0_3, %c0_4] : memref<16x16xf32, #tpu.memory_space<vmem>>, vector<16x16xf32>
    %c0_5 = arith.constant 0 : index
    %c0_6 = arith.constant 0 : index
    %3 = vector.load %arg4[%c0_5, %c0_6] : memref<16x1xf32, #tpu.memory_space<vmem>>, vector<16x1xf32>
    %c0_7 = arith.constant 0 : index
    %c0_8 = arith.constant 0 : index
    %4 = vector.load %arg5[%c0_7, %c0_8] : memref<256x256xf32, #tpu.memory_space<vmem>>, vector<256x256xf32>
    %cst = arith.constant dense<0.000000e+00> : vector<16x256xf32>
    %5 = tpu.matmul %1, %0, %cst {dimension_numbers = #tpu.dot_dimension_numbers<[1], [0], [0], [1], [0, 0, 1, 1], [], []>} : vector<16x5xf32>, vector<5x256xf32>, vector<16x256xf32> -> vector<16x256xf32>
    %cst_9 = arith.constant 0.000000e+00 : f32
    %6 = vector.broadcast %cst_9 : f32 to vector<16x256xf32>
    %7 = arith.maximumf %5, %6 : vector<16x256xf32>
    %8 = vector.extract_strided_slice %7 {offsets = [0, 0], sizes = [8, 256], strides = [1, 1]} : vector<16x256xf32> to vector<8x256xf32>
    %9 = vector.extract_strided_slice %7 {offsets = [8, 0], sizes = [8, 256], strides = [1, 1]} : vector<16x256xf32> to vector<8x256xf32>
    %cst_10 = arith.constant dense<0.000000e+00> : vector<8x256xf32>
    %10 = tpu.matmul %9, %4, %cst_10 {dimension_numbers = #tpu.dot_dimension_numbers<[1], [0], [0], [1], [0, 0, 1, 1], [], []>} : vector<8x256xf32>, vector<256x256xf32>, vector<8x256xf32> -> vector<8x256xf32>
    %11 = tpu.concatenate %8, %10 in 0 : vector<8x256xf32>, vector<8x256xf32> -> vector<16x256xf32>
    %cst_11 = arith.constant dense<0.000000e+00> : vector<16x256xf32>
    %12 = tpu.matmul %2, %11, %cst_11 {dimension_numbers = #tpu.dot_dimension_numbers<[1], [0], [0], [1], [0, 0, 1, 1], [], []>} : vector<16x16xf32>, vector<16x256xf32>, vector<16x256xf32> -> vector<16x256xf32>
    %13 = vector.broadcast %3 : vector<16x1xf32> to vector<16x256xf32>
    %14 = arith.addf %12, %13 : vector<16x256xf32>
    %15 = vector.extract_strided_slice %14 {offsets = [0, 0], sizes = [8, 256], strides = [1, 1]} : vector<16x256xf32> to vector<8x256xf32>
    %c0_12 = arith.constant 0 : index
    %c0_13 = arith.constant 0 : index
    %16 = vector.load %arg6[%c0_12, %c0_13] : memref<16x256xf32, #tpu.memory_space<vmem>>, vector<8x256xf32>
    tpu.vector_store %arg6[%c0_12, %c0_13], %15 {strides = array<i32>} : memref<16x256xf32, #tpu.memory_space<vmem>>, vector<8x256xf32>,
    %17 = vector.extract_strided_slice %14 {offsets = [8, 0], sizes = [8, 256], strides = [1, 1]} : vector<16x256xf32> to vector<8x256xf32>
    %cst_14 = arith.constant dense<0.000000e+00> : vector<8x256xf32>
    %18 = tpu.matmul %17, %4, %cst_14 {dimension_numbers = #tpu.dot_dimension_numbers<[1], [0], [0], [1], [0, 0, 1, 1], [], []>} : vector<8x256xf32>, vector<256x256xf32>, vector<8x256xf32> -> vector<8x256xf32>
    %c8 = arith.constant 8 : index
    %c0_15 = arith.constant 0 : index
    %19 = vector.load %arg6[%c8, %c0_15] : memref<16x256xf32, #tpu.memory_space<vmem>>, vector<8x256xf32>
    tpu.vector_store %arg6[%c8, %c0_15], %18 {strides = array<i32>} : memref<16x256xf32, #tpu.memory_space<vmem>>, vector<8x256xf32>,
    return
  }
  func.func @transform_0(%arg0: i32) -> (i32, i32) {
    %c0_i32 = arith.constant 0 : i32
    %c0_i32_0 = arith.constant 0 : i32
    %c0_i32_1 = arith.constant 0 : i32
    return %c0_i32, %c0_i32_0 : i32, i32
  }
  func.func @transform_1(%arg0: i32) -> (i32, i32) {
    %c0_i32 = arith.constant 0 : i32
    %c0_i32_0 = arith.constant 0 : i32
    %c0_i32_1 = arith.constant 0 : i32
    return %c0_i32, %c0_i32_0 : i32, i32
  }
  func.func @transform_2(%arg0: i32) -> (i32, i32) {
    %c0_i32 = arith.constant 0 : i32
    %c0_i32_0 = arith.constant 0 : i32
    %c0_i32_1 = arith.constant 0 : i32
    return %c0_i32, %c0_i32_0 : i32, i32
  }
  func.func @transform_3(%arg0: i32) -> (i32, i32) {
    %c0_i32 = arith.constant 0 : i32
    %c0_i32_0 = arith.constant 0 : i32
    %c0_i32_1 = arith.constant 0 : i32
    return %c0_i32, %c0_i32_0 : i32, i32
  }
  func.func @transform_4(%arg0: i32) -> (i32, i32) {
    %c0_i32 = arith.constant 0 : i32
    %c0_i32_0 = arith.constant 0 : i32
    %c0_i32_1 = arith.constant 0 : i32
    return %c0_i32, %c0_i32_0 : i32, i32
  }
  func.func @transform_5(%arg0: i32) -> (i32, i32) {
    %c0_i32 = arith.constant 0 : i32
    %c0_i32_0 = arith.constant 0 : i32
    %c0_i32_1 = arith.constant 0 : i32
    return %c0_i32, %c0_i32_0 : i32, i32
  }
}

</mosaic_0001>

<bundles_post_ra>
// kernel: phi_forward.1
= control target key start
LH: loop header
LB: loop body
LE: loop exit
PB: predicated region body
PF: predicated region fallthrough
CT: control target
= control target key end

     0   :  { %vm99_vm0 = vcmask 1044480   ;;  %v572_v2 = vmov 0.0   ;;  %vm92_vm1 = vcmask 39936   ;;  %vm268_vm2 = vcmask 130048   ;;  %s966_s0 = inlined_call_operand.vmem [shape: f32[5,256], index: 0, kind: input, shape index: {}]   ;;  %s967_s1 = inlined_call_operand.vmem [shape: f32[16,5], index: 1, kind: input, shape index: {}]   ;;  %s968_s4 = inlined_call_operand.vmem [shape: f32[256,256], index: 4, kind: input, shape index: {}]   ;;  %s969_s3 = inlined_call_operand.vmem [shape: f32[16,1], index: 3, kind: input, shape index: {}]   ;;  %s970_s2 = inlined_call_operand.vmem [shape: f32[16,16], index: 2, kind: input, shape index: {}]   ;;  %s971_s5 = inlined_call_operand.vmem [shape: f32[16,256], index: 5, kind: output, shape index: {}]  }
   0x1   :  { %v21_v0 = vld [vmem:[%s966_s0 + $0x8] sm:$0x1f]  ;;  %v20_v1 = vld [vmem:[%s966_s0] sm:$0x1f]  ;;  %170 = vmatprep.mubr.f32.mxu1 %v572_v2  ;;  %339 = vmatprep.mubr.f32.mxu0 %v572_v2  ;;  %v31_v5 = vld [vmem:[%s968_s4 + $0x18] sm:$0xff] }
   0x2   :  { %v22_v3 = vld [vmem:[%s967_s1] sm:$0xff]  ;;  %431 = vmatprep.subr.msk.mxu1 %vm99_vm0, %v21_v0  ;;  %v29_v4 = vld [vmem:[%s968_s4 + $0x8] sm:$0xff]  ;;  %v30_v8 = vld [vmem:[%s968_s4 + $0x10] sm:$0xff] }
   0x3   :  { %432 = vmatpush1.msk.msra.mxu1 %vm99_vm0, %v20_v1  ;;  %v621_v6 = vpack.c.bf16 %v31_v5, %v29_v4  ;;  %v28_v7 = vld [vmem:[%s968_s4] sm:$0xff]  ;;  %v33_v9 = vld [vmem:[%s968_s4 + $0x28] sm:$0xff]  ;;  %v35_v11 = vld [vmem:[%s968_s4 + $0x38] sm:$0xff] }
   0x4   :  { %433 = vmatmul.mubr.msk.f32.vlgmr.msra.gmra.mrb[0].mxu1 %vm92_vm1, %v22_v3  ;;  %v633_v10 = vpack.c.bf16 %v30_v8, %v28_v7  ;;  %v32_v12 = vld [vmem:[%s968_s4 + $0x20] sm:$0xff]  ;;  %v34_v13 = vld [vmem:[%s968_s4 + $0x30] sm:$0xff]  ;;  %v23_v14 = vld [vmem:[%s967_s1 + $0x8] sm:$0xff]  ;;  %v649_v15 = vpack.c.bf16 %v35_v11, %v33_v9 }
   0x5   :  { %176 = vmatprep.mubr.f32.mxu1 %v572_v2  ;;  %438 = vmatprep.subr.bf16.mxu1 %v621_v6  ;;  %v37_v16 = vld [vmem:[%s968_s4 + $0x48] sm:$0xff]  ;;  %v39_v17 = vld [vmem:[%s968_s4 + $0x58] sm:$0xff]  ;;  %v658_v18 = vpack.c.bf16 %v34_v13, %v32_v12  ;;  %v36_v20 = vld [vmem:[%s968_s4 + $0x40] sm:$0xff] }
   0x6   :  { %440 = vmatpush1.bf16.msra.mxu1 %v633_v10  ;;  %v661_v19 = vpack.c.bf16 %v39_v17, %v37_v16  ;;  %v38_v21 = vld [vmem:[%s968_s4 + $0x50] sm:$0xff]  ;;  %v41_v22 = vld [vmem:[%s968_s4 + $0x68] sm:$0xff]  ;;  %v43_v23 = vld [vmem:[%s968_s4 + $0x78] sm:$0xff] }
   0x7   :  { %442 = vmatprep.subr.bf16.mxu1 %v649_v15  ;;  %v677_v24 = vpack.c.bf16 %v38_v21, %v36_v20  ;;  %v680_v25 = vpack.c.bf16 %v43_v23, %v41_v22  ;;  %v40_v26 = vld [vmem:[%s968_s4 + $0x60] sm:$0xff]  ;;  %v42_v27 = vld [vmem:[%s968_s4 + $0x70] sm:$0xff]  ;;  %v45_v28 = vld [vmem:[%s968_s4 + $0x88] sm:$0xff] }
   0x8   :  { %434 = vmatmul.mubr.msk.f32.gmra.mrb[2].mxu1 %vm92_vm1, %v23_v14  ;;  %v47_v29 = vld [vmem:[%s968_s4 + $0x98] sm:$0xff]  ;;  %v695_v30 = vpack.c.bf16 %v42_v27, %v40_v26  ;;  %v44_v32 = vld [vmem:[%s968_s4 + $0x80] sm:$0xff]  ;;  %v46_v33 = vld [vmem:[%s968_s4 + $0x90] sm:$0xff] }
   0x9   :  { %v698_v31 = vpack.c.bf16 %v47_v29, %v45_v28  ;;  %v49_v34 = vld [vmem:[%s968_s4 + $0xa8] sm:$0xff]  ;;  %v51_v35 = vld [vmem:[%s968_s4 + $0xb8] sm:$0xff]  ;;  %v713_v36 = vpack.c.bf16 %v46_v33, %v44_v32  ;;  %v48_v38 = vld [vmem:[%s968_s4 + $0xa0] sm:$0xff] }
   0xa   :  { %444 = vmatpush1.bf16.msra.mxu1 %v658_v18  ;;  %v716_v37 = vpack.c.bf16 %v51_v35, %v49_v34  ;;  %v50_v39 = vld [vmem:[%s968_s4 + $0xb0] sm:$0xff]  ;;  %v53_v40 = vld [vmem:[%s968_s4 + $0xc8] sm:$0xff]  ;;  %v55_v41 = vld [vmem:[%s968_s4 + $0xd8] sm:$0xff] }
   0xb   :  { %446 = vmatprep.subr.bf16.mxu1 %v661_v19  ;;  %v731_v42 = vpack.c.bf16 %v50_v39, %v48_v38  ;;  %v734_v43 = vpack.c.bf16 %v55_v41, %v53_v40  ;;  %v52_v44 = vld [vmem:[%s968_s4 + $0xc0] sm:$0xff]  ;;  %v54_v45 = vld [vmem:[%s968_s4 + $0xd0] sm:$0xff]  ;;  %v57_v46 = vld [vmem:[%s968_s4 + $0xe8] sm:$0xff] }
   0xc   :  { %v59_v47 = vld [vmem:[%s968_s4 + $0xf8] sm:$0xff]  ;;  %v749_v48 = vpack.c.bf16 %v54_v45, %v52_v44  ;;  %v56_v50 = vld [vmem:[%s968_s4 + $0xe0] sm:$0xff]  ;;  %v58_v51 = vld [vmem:[%s968_s4 + $0xf0] sm:$0xff] }
   0xd   :  { %v752_v49 = vpack.c.bf16 %v59_v47, %v57_v46  ;;  %v61_v52 = vld [vmem:[%s968_s4 + $0x108] sm:$0xff]  ;;  %v63_v53 = vld [vmem:[%s968_s4 + $0x118] sm:$0xff]  ;;  %v767_v54 = vpack.c.bf16 %v58_v51, %v56_v50  ;;  %v60_v56 = vld [vmem:[%s968_s4 + $0x100] sm:$0xff] }
   0xe   :  { %448 = vmatpush1.bf16.msra.mxu1 %v677_v24  ;;  %v770_v55 = vpack.c.bf16 %v63_v53, %v61_v52  ;;  %v62_v57 = vld [vmem:[%s968_s4 + $0x110] sm:$0xff]  ;;  %v65_v58 = vld [vmem:[%s968_s4 + $0x128] sm:$0xff]  ;;  %v67_v59 = vld [vmem:[%s968_s4 + $0x138] sm:$0xff] }
   0xf   :  { %450 = vmatprep.subr.bf16.mxu1 %v680_v25  ;;  %v785_v60 = vpack.c.bf16 %v62_v57, %v60_v56  ;;  %v788_v61 = vpack.c.bf16 %v67_v59, %v65_v58  ;;  %v64_v62 = vld [vmem:[%s968_s4 + $0x120] sm:$0xff]  ;;  %v66_v63 = vld [vmem:[%s968_s4 + $0x130] sm:$0xff]  ;;  %v69_v0 = vld [vmem:[%s968_s4 + $0x148] sm:$0xff] }
  0x10   :  { %v71_v1 = vld [vmem:[%s968_s4 + $0x158] sm:$0xff]  ;;  %v803_v3 = vpack.c.bf16 %v66_v63, %v64_v62  ;;  %v68_v5 = vld [vmem:[%s968_s4 + $0x140] sm:$0xff]  ;;  %v70_v7 = vld [vmem:[%s968_s4 + $0x150] sm:$0xff]  ;;  %v573_v63 = vmov 0  }
  0x11   :  { %v806_v4 = vpack.c.bf16 %v71_v1, %v69_v0  ;;  %v73_v8 = vld [vmem:[%s968_s4 + $0x168] sm:$0xff]  ;;  %v75_v9 = vld [vmem:[%s968_s4 + $0x178] sm:$0xff]  ;;  %v821_v11 = vpack.c.bf16 %v70_v7, %v68_v5  ;;  %v72_v13 = vld [vmem:[%s968_s4 + $0x160] sm:$0xff]  ;;  %571 = vset.pattern.permute.xlu0 %v573_v63 }
  0x12   :  { %452 = vmatpush1.bf16.msra.mxu1 %v695_v30  ;;  %v824_v12 = vpack.c.bf16 %v75_v9, %v73_v8  ;;  %v74_v14 = vld [vmem:[%s968_s4 + $0x170] sm:$0xff]  ;;  %v77_v16 = vld [vmem:[%s968_s4 + $0x188] sm:$0xff]  ;;  %v79_v17 = vld [vmem:[%s968_s4 + $0x198] sm:$0xff] }
  0x13   :  { %454 = vmatprep.subr.bf16.mxu1 %v698_v31  ;;  %v839_v20 = vpack.c.bf16 %v74_v14, %v72_v13  ;;  %v842_v21 = vpack.c.bf16 %v79_v17, %v77_v16  ;;  %v76_v22 = vld [vmem:[%s968_s4 + $0x180] sm:$0xff]  ;;  %v78_v23 = vld [vmem:[%s968_s4 + $0x190] sm:$0xff]  ;;  %v81_v26 = vld [vmem:[%s968_s4 + $0x1a8] sm:$0xff] }
  0x14   :  { %v83_v27 = vld [vmem:[%s968_s4 + $0x1b8] sm:$0xff]  ;;  %v857_v28 = vpack.c.bf16 %v78_v23, %v76_v22  ;;  %v80_v32 = vld [vmem:[%s968_s4 + $0x1a0] sm:$0xff]  ;;  %v82_v33 = vld [vmem:[%s968_s4 + $0x1b0] sm:$0xff] }
  0x15   :  { %v860_v29 = vpack.c.bf16 %v83_v27, %v81_v26  ;;  %v869_v34 = vpack.c.bf16 %v82_v33, %v80_v32  ;;  %v85_v35 = vld [vmem:[%s968_s4 + $0x1c8] sm:$0xff]  ;;  %v87_v38 = vld [vmem:[%s968_s4 + $0x1d8] sm:$0xff]  ;;  %v84_v40 = vld [vmem:[%s968_s4 + $0x1c0] sm:$0xff] }
  0x16   :  { %456 = vmatpush1.bf16.msra.mxu1 %v713_v36  ;;  %v879_v39 = vpack.c.bf16 %v87_v38, %v85_v35  ;;  %v86_v41 = vld [vmem:[%s968_s4 + $0x1d0] sm:$0xff]  ;;  %v89_v45 = vld [vmem:[%s968_s4 + $0x1e8] sm:$0xff]  ;;  %v91_v46 = vld [vmem:[%s968_s4 + $0x1f8] sm:$0xff] }
  0x17   :  { %458 = vmatprep.subr.bf16.mxu1 %v716_v37  ;;  %v887_v44 = vpack.c.bf16 %v86_v41, %v84_v40  ;;  %v897_v47 = vpack.c.bf16 %v91_v46, %v89_v45  ;;  %v88_v50 = vld [vmem:[%s968_s4 + $0x1e0] sm:$0xff]  ;;  %v90_v51 = vld [vmem:[%s968_s4 + $0x1f0] sm:$0xff]  ;;  %v27_v0 = vld [vmem:[%s969_s3 + $0x8] sm:$0xff] }
  0x18   :  { %v905_v52 = vpack.c.bf16 %v90_v51, %v88_v50  ;;  %265 = vperm.xlu0 %571, %v27_v0   ;;  %v26_v1 = vld [vmem:[%s969_s3] sm:$0xff]  ;;  %v25_v17 = vld [vmem:[%s970_s2 + $0x8] sm:$0xff] }
  0x19   :  { %v24_v16 = vld [vmem:[%s970_s2] sm:$0xff] }
  0x1a   :  { %460 = vmatpush1.bf16.msra.mxu1 %v731_v42 }
  0x1b   :  { %462 = vmatprep.subr.bf16.mxu1 %v734_v43 }
  0x1c   :  { %260 = vperm.xlu0 %571, %v26_v1  }
  0x1e   :  { %464 = vmatpush1.bf16.msra.mxu1 %v749_v48 }
  0x1f   :  { %466 = vmatprep.subr.bf16.mxu1 %v752_v49 }
  0x22   :  { %468 = vmatpush1.bf16.msra.mxu1 %v767_v54 }
  0x23   :  { %470 = vmatprep.subr.bf16.mxu1 %v770_v55 }
  0x26   :  { %472 = vmatpush1.bf16.msra.mxu1 %v785_v60 }
  0x27   :  { %474 = vmatprep.subr.bf16.mxu1 %v788_v61 }
  0x2a   :  { %476 = vmatpush1.bf16.msra.mxu1 %v803_v3 }
  0x2b   :  { %478 = vmatprep.subr.bf16.mxu1 %v806_v4 }
  0x2e   :  { %480 = vmatpush1.bf16.msra.mxu1 %v821_v11 }
  0x2f   :  { %482 = vmatprep.subr.bf16.mxu1 %v824_v12 }
  0x32   :  { %484 = vmatpush1.bf16.msra.mxu1 %v839_v20 }
  0x33   :  { %486 = vmatprep.subr.bf16.mxu1 %v842_v21 }
  0x36   :  { %488 = vmatpush1.bf16.msra.mxu1 %v857_v28 }
  0x37   :  { %490 = vmatprep.subr.bf16.mxu1 %v860_v29 }
  0x3a   :  { %492 = vmatpush1.bf16.msra.mxu1 %v869_v34 }
  0x3b   :  { %494 = vmatprep.subr.bf16.mxu1 %v879_v39 }
  0x3e   :  { %496 = vmatpush1.bf16.msra.mxu1 %v887_v44 }
  0x3f   :  { %498 = vmatprep.subr.bf16.mxu1 %v897_v47 }
  0x42   :  { %500 = vmatpush1.bf16.msra.mxu1 %v905_v52 }
  0xd7   :  { %v172_v53 = vpop.f32.mrb[0].mxu1 }
  0xd8   :  { %v174_v56 = vpop.f32.mrb[1].mxu1  ;;  %v183_v5 = vmax.f32 %v172_v53, 0.0 }
  0xd9   :  { %v184_v7 = vmax.f32 %v174_v56, 0.0 }
  0xdb   :  { %v178_v57 = vpop.f32.mrb[2].mxu1 }
  0xdc   :  { %v180_v58 = vpop.f32.mrb[3].mxu1  ;;  %v185_v62 = vmax.f32 %v178_v57, 0.0 }
  0xdd   :  { %v186_v59 = vmax.f32 %v180_v58, 0.0 }
  0xdf   :  { %251 = vmatprep.mubr.f32.mxu1 %v186_v59 }
  0xe0   :  { %252 = vmatmul.mubr.f32.vlgmr.msra.gmra.mrb[4].mxu1 %v185_v62 }
 0x1b3   :  { %v253_v8 = vpop.f32.mrb[4].mxu1 }
 0x1b4   :  { %v503_v9 = vpack.c.bf16 %v253_v8, %v183_v5  ;;  %v255_v13 = vpop.f32.mrb[5].mxu1 }
 0x1b5   :  { %v501_v14 = vpack.c.bf16 %v255_v13, %v184_v7 }
 0x1b7   :  { %502 = vmatprep.subr.bf16.mxu0 %v501_v14 }
 0x1b8   :  { %504 = vmatpush1.bf16.msra.mxu0 %v503_v9 }
 0x1b9   :  { %506 = vmatprep.subr.bf16.mxu0 %v621_v6 }
 0x1bb   :  { %435 = vmatmul.mubr.msk.f32.vlgmr.msra.gmra.mrb[0].mxu0 %vm268_vm2, %v24_v16 }
 0x1bc   :  { %345 = vmatprep.mubr.f32.mxu0 %v572_v2  ;;  %508 = vmatpush1.bf16.msra.mxu0 %v633_v10  ;;  %v266_v2 = vpop.permute.xlu0 %265 }
 0x1bd   :  { %510 = vmatprep.subr.bf16.mxu0 %v649_v15 }
 0x1bf   :  { %436 = vmatmul.mubr.msk.f32.gmra.mrb[2].mxu0 %vm268_vm2, %v25_v17 }
 0x1c0   :  { %512 = vmatpush1.bf16.msra.mxu0 %v658_v18  ;;  %v261_v6 = vpop.permute.xlu0 %260 }
 0x1c1   :  { %514 = vmatprep.subr.bf16.mxu0 %v661_v19 }
 0x1c4   :  { %516 = vmatpush1.bf16.msra.mxu0 %v677_v24 }
 0x1c5   :  { %518 = vmatprep.subr.bf16.mxu0 %v680_v25 }
 0x1c8   :  { %520 = vmatpush1.bf16.msra.mxu0 %v695_v30 }
 0x1c9   :  { %522 = vmatprep.subr.bf16.mxu0 %v698_v31 }
 0x1cc   :  { %524 = vmatpush1.bf16.msra.mxu0 %v713_v36 }
 0x1cd   :  { %526 = vmatprep.subr.bf16.mxu0 %v716_v37 }
 0x1d0   :  { %528 = vmatpush1.bf16.msra.mxu0 %v731_v42 }
 0x1d1   :  { %530 = vmatprep.subr.bf16.mxu0 %v734_v43 }
 0x1d4   :  { %532 = vmatpush1.bf16.msra.mxu0 %v749_v48 }
 0x1d5   :  { %534 = vmatprep.subr.bf16.mxu0 %v752_v49 }
 0x1d8   :  { %536 = vmatpush1.bf16.msra.mxu0 %v767_v54 }
 0x1d9   :  { %538 = vmatprep.subr.bf16.mxu0 %v770_v55 }
 0x1dc   :  { %540 = vmatpush1.bf16.msra.mxu0 %v785_v60 }
 0x1dd   :  { %542 = vmatprep.subr.bf16.mxu0 %v788_v61 }
 0x1e0   :  { %544 = vmatpush1.bf16.msra.mxu0 %v803_v3 }
 0x1e1   :  { %546 = vmatprep.subr.bf16.mxu0 %v806_v4 }
 0x1e4   :  { %548 = vmatpush1.bf16.msra.mxu0 %v821_v11 }
 0x1e5   :  { %550 = vmatprep.subr.bf16.mxu0 %v824_v12 }
 0x1e8   :  { %552 = vmatpush1.bf16.msra.mxu0 %v839_v20 }
 0x1e9   :  { %554 = vmatprep.subr.bf16.mxu0 %v842_v21 }
 0x1ec   :  { %556 = vmatpush1.bf16.msra.mxu0 %v857_v28 }
 0x1ed   :  { %558 = vmatprep.subr.bf16.mxu0 %v860_v29 }
 0x1f0   :  { %560 = vmatpush1.bf16.msra.mxu0 %v869_v34 }
 0x1f1   :  { %562 = vmatprep.subr.bf16.mxu0 %v879_v39 }
 0x1f4   :  { %564 = vmatpush1.bf16.msra.mxu0 %v887_v44 }
 0x1f5   :  { %566 = vmatprep.subr.bf16.mxu0 %v897_v47 }
 0x1f8   :  { %568 = vmatpush1.bf16.msra.mxu0 %v905_v52 }
 0x28e   :  { %v341_v10 = vpop.f32.mrb[0].mxu0 }
 0x28f   :  { %v342_v15 = vadd.f32 %v341_v10, %v261_v6  ;;  %v343_v18 = vpop.f32.mrb[1].mxu0 }
 0x290   :  { %v344_v19 = vadd.f32 %v343_v18, %v261_v6 }
 0x291   :  { %352 = vst [vmem:[%s971_s5] sm:$0xff] %v342_v15 }
 0x292   :  { %353 = vst [vmem:[%s971_s5 + $0x8] sm:$0xff] %v344_v19  ;;  %v347_v24 = vpop.f32.mrb[2].mxu0 }
 0x293   :  { %v349_v25 = vpop.f32.mrb[3].mxu0  ;;  %v348_v31 = vadd.f32 %v347_v24, %v266_v2 }
 0x294   :  { %v350_v30 = vadd.f32 %v349_v25, %v266_v2 }
 0x296   :  { %418 = vmatprep.mubr.f32.mxu0 %v350_v30 }
 0x297   :  { %419 = vmatmul.mubr.f32.vlgmr.msra.gmra.mrb[4].mxu0 %v348_v31 }
 0x36a   :  { %v420_v36 = vpop.f32.mrb[4].mxu0 }
 0x36b   :  { %425 = vst [vmem:[%s971_s5 + $0x10] sm:$0xff] %v420_v36  ;;  %v422_v37 = vpop.f32.mrb[5].mxu0 }
 0x36c   :  { %426 = vst [vmem:[%s971_s5 + $0x18] sm:$0xff] %v422_v37 }

</bundles_post_ra>
